<compile_context>
chip_gen: v7x
topology: tpu7x:2x2x1
jax: 0.10.0
libtpu: 0.0.40
codegen_flags: <defaults>
</compile_context>

<pallas_src>
import jax
import jax.numpy as jnp
from jax.experimental import pallas as pl
from jax.experimental.pallas import tpu as pltpu


def _normalize2d_kernel(x_ref, scale_ref, bias_ref, o_ref):
    # x_ref:     (rows_per_block, C) data tile (lane-dense, C = D1*T)
    # scale_ref: (rows_per_block, C) fused 1/std, resident (constant index map)
    # bias_ref:  (rows_per_block, C) fused -mean/std, resident
    x = x_ref[...].astype(scale_ref.dtype)
    o_ref[...] = (x * scale_ref[...] + bias_ref[...]).astype(o_ref.dtype)


def normalize2d(x, mean, std, *, target_block_bytes=1 * 1024 * 1024):
    """Eval-mode Normalize2D.  x: [B, D0, D1, T]; mean/std: [1, D0, D1, 1]."""
    B, D0, D1, T = x.shape
    assert mean.shape == (1, D0, D1, 1)
    assert std.shape == (1, D0, D1, 1)

    R = B * D0          # rows of the lane-dense 2D view
    C = D1 * T          # lane axis of the lane-dense 2D view (untiled, full extent)

    # Fused affine parameters, computed once on the tiny parameter tensors
    # with an exact (non-approx) reciprocal so accuracy stays at ~ulp level.
    compute_dtype = jnp.promote_types(x.dtype, jnp.float32)
    inv_std = 1.0 / std.astype(compute_dtype)                  # (1, D0, D1, 1)
    bias = -mean.astype(compute_dtype) * inv_std               # (1, D0, D1, 1)

    # Lane-dense expansion: element [d0, d1*T + t] = param[d0, d1].
    scale_dc = jnp.repeat(inv_std.reshape(D0, D1), T, axis=1)  # (D0, C)
    bias_dc = jnp.repeat(bias.reshape(D0, D1), T, axis=1)      # (D0, C)

    # Pick how many batch elements go in one row-tile (bk | B).  Valid
    # candidates keep the sublane extent a multiple of 8 (or the full row
    # count).  Among those, pick the largest one fitting the byte target;
    # if even a single batch element overshoots, fall back to the smallest
    # valid candidate to minimize VMEM pressure.
    itemsize = jnp.dtype(x.dtype).itemsize
    bytes_per_batch = D0 * C * itemsize
    valid = [c for c in range(1, B + 1)
             if B % c == 0 and ((c * D0) % 8 == 0 or c * D0 == R)]
    fitting = [c for c in valid if c * bytes_per_batch <= target_block_bytes]
    bk = max(fitting) if fitting else min(valid)

    rows_per_block = bk * D0
    grid = (B // bk,)

    # Pre-tile scale/bias to the block shape: every row-block starts at a
    # batch boundary, so the (D0, C) pattern repeated bk times matches every
    # block -> constant index_map, DMA'd once, zero in-kernel broadcasts.
    scale_tile = jnp.tile(scale_dc, (bk, 1))                   # (rows_per_block, C)
    bias_tile = jnp.tile(bias_dc, (bk, 1))                     # (rows_per_block, C)

    x2 = x.reshape(R, C)   # row-major, free re-view

    out2 = pl.pallas_call(
        _normalize2d_kernel,
        out_shape=jax.ShapeDtypeStruct((R, C), x.dtype),
        grid_spec=pltpu.PrefetchScalarGridSpec(
            num_scalar_prefetch=0,
            grid=grid,
            in_specs=[
                pl.BlockSpec((rows_per_block, C), lambda i: (i, 0)),
                pl.BlockSpec((rows_per_block, C), lambda i: (0, 0)),
                pl.BlockSpec((rows_per_block, C), lambda i: (0, 0)),
            ],
            out_specs=pl.BlockSpec((rows_per_block, C), lambda i: (i, 0)),
        ),
        compiler_params=pltpu.CompilerParams(
            dimension_semantics=("parallel",),
        ),
    )(x2, scale_tile, bias_tile)

    return out2.reshape(B, D0, D1, T)


if __name__ == "__main__":
    # dimensions = (D0, D1) = (4, 16); batch B=2, trailing T=16
    B, D0, D1, T = 2, 4, 16, 16

    key = jax.random.PRNGKey(0)
    kx, km, ks = jax.random.split(key, 3)

    x = jax.random.normal(kx, (B, D0, D1, T), dtype=jnp.float32)

    # Deterministic "parameters": module init is zeros/ones; perturb
    # deterministically so the kernel actually does broadcasting work.
    mean = jnp.zeros((1, D0, D1, 1), jnp.float32) + \
        0.1 * jax.random.normal(km, (1, D0, D1, 1), dtype=jnp.float32)
    std = jnp.ones((1, D0, D1, 1), jnp.float32) + \
        0.05 * jnp.abs(jax.random.normal(ks, (1, D0, D1, 1), dtype=jnp.float32))

    out = normalize2d(x, mean, std)
    out = jax.block_until_ready(out)

    # Cross-check against plain-JAX reference of the eval-mode forward.
    # (scale/bias fusion reassociates the math -> allow a few-ulp tolerance.)
    ref = (x - mean) / std
    assert out.shape == x.shape and out.dtype == x.dtype
    assert jnp.allclose(out, ref, atol=1e-5, rtol=1e-5)

    print("KERNEL_OK")
</pallas_src>

<mosaic_0001>
module attributes {stable_mosaic.version = 11 : i64} {
  func.func @_normalize2d_kernel(%arg0: i32, %arg1: memref<8x256xf32, #tpu.memory_space<vmem>>, %arg2: memref<8x256xf32, #tpu.memory_space<vmem>>, %arg3: memref<8x256xf32, #tpu.memory_space<vmem>>, %arg4: memref<8x256xf32, #tpu.memory_space<vmem>>) attributes {dimension_semantics = [#tpu.dimension_semantics<parallel>], iteration_bounds = array<i64: 1>, scalar_prefetch = 0 : i64, scratch_operands = 0 : i64, tpu.core_type = #tpu.core_type<tc>, window_params = [{transform_indices = @transform_0, window_bounds = array<i64: 8, 256>}, {pipeline_mode = #tpu.pipeline_mode<synchronous>, transform_indices = @transform_1, window_bounds = array<i64: 8, 256>}, {pipeline_mode = #tpu.pipeline_mode<synchronous>, transform_indices = @transform_2, window_bounds = array<i64: 8, 256>}, {transform_indices = @transform_3, window_bounds = array<i64: 8, 256>}]} {
    %c0 = arith.constant 0 : index
    %c0_0 = arith.constant 0 : index
    %0 = vector.load %arg1[%c0, %c0_0] : memref<8x256xf32, #tpu.memory_space<vmem>>, vector<8x256xf32>
    %c0_1 = arith.constant 0 : index
    %c0_2 = arith.constant 0 : index
    %1 = vector.load %arg2[%c0_1, %c0_2] : memref<8x256xf32, #tpu.memory_space<vmem>>, vector<8x256xf32>
    %2 = arith.mulf %0, %1 : vector<8x256xf32>
    %c0_3 = arith.constant 0 : index
    %c0_4 = arith.constant 0 : index
    %3 = vector.load %arg3[%c0_3, %c0_4] : memref<8x256xf32, #tpu.memory_space<vmem>>, vector<8x256xf32>
    %4 = arith.addf %2, %3 : vector<8x256xf32>
    %c0_5 = arith.constant 0 : index
    %c0_6 = arith.constant 0 : index
    %5 = vector.load %arg4[%c0_5, %c0_6] : memref<8x256xf32, #tpu.memory_space<vmem>>, vector<8x256xf32>
    tpu.vector_store %arg4[%c0_5, %c0_6], %4 {strides = array<i32>} : memref<8x256xf32, #tpu.memory_space<vmem>>, vector<8x256xf32>,
    return
  }
  func.func @transform_0(%arg0: i32) -> (i32, i32) {
    %c0_i32 = arith.constant 0 : i32
    %c0_i32_0 = arith.constant 0 : i32
    return %arg0, %c0_i32 : i32, i32
  }
  func.func @transform_1(%arg0: i32) -> (i32, i32) {
    %c0_i32 = arith.constant 0 : i32
    %c0_i32_0 = arith.constant 0 : i32
    %c0_i32_1 = arith.constant 0 : i32
    return %c0_i32, %c0_i32_0 : i32, i32
  }
  func.func @transform_2(%arg0: i32) -> (i32, i32) {
    %c0_i32 = arith.constant 0 : i32
    %c0_i32_0 = arith.constant 0 : i32
    %c0_i32_1 = arith.constant 0 : i32
    return %c0_i32, %c0_i32_0 : i32, i32
  }
  func.func @transform_3(%arg0: i32) -> (i32, i32) {
    %c0_i32 = arith.constant 0 : i32
    %c0_i32_0 = arith.constant 0 : i32
    return %arg0, %c0_i32 : i32, i32
  }
}

</mosaic_0001>

<bundles_post_ra>
// kernel: tpu_custom_call.1
= control target key start
LH: loop header
LB: loop body
LE: loop exit
PB: predicated region body
PF: predicated region fallthrough
CT: control target
= control target key end

     0   :  { %8 = vsyncpa [#allocation3], 0  ;;  %s248_s0 = inlined_call_operand.hbm [shape: f32[8,256], index: 0, kind: input, shape index: {}]   ;;  %s249_s1 = inlined_call_operand.hbm [shape: f32[8,256], index: 1, kind: input, shape index: {}]   ;;  %s250_s2 = inlined_call_operand.hbm [shape: f32[8,256], index: 2, kind: input, shape index: {}]   ;;  %s251_s3 = inlined_call_operand.hbm [shape: f32[8,256], index: 3, kind: output, shape index: {}]  }
   0x1   :  { %9 = vsyncpa [#allocation6], 0 }
   0x2   :  { %10 = vsyncpa [#allocation4], 0  ;;  %s176_s12 = smov [#allocation5]   ;;  %s177_s14 = smov [#allocation2]  }
   0x3   :  { %s27_s13 = sshll.u32 %s176_s12, 4  ;;  %s17_s15 = sshll.u32 %s177_s14, 4  ;;  %s28_s13 = int_to_ptr.vmem [resolvable:$true] %s27_s13  ;;  %s18_s15 = int_to_ptr.vmem [resolvable:$true] %s17_s15 }
   0x4   :  { %s82_s18 = scalar_lea.hbm %s249_s1, 256 }
   0x5   :  { %p83_p0 = scmp.ne.s32.totalorder %s249_s1, %s82_s18  ;;  %p86_p1 = scmp.lt.u32.totalorder %s82_s18, %s249_s1 }
   0x7   :  { %p88_p2 = pnand %p86_p1, %p83_p0 }
   0x9   :  { %91 = shalt.err (!%p88_p2)
}
   0xa   :  { %s92_s23 = scalar_lea.vmem %s28_s13, 256  ;;  %p97_p4 = scmp.lt.s32.totalorder %s28_s13, %s28_s13 }
   0xb   :  { %p93_p3 = scmp.ne.s32.totalorder %s28_s13, %s92_s23  ;;  %p98_p5 = scmp.lt.s32.totalorder %s92_s23, %s92_s23 }
   0xd   :  { %p99_p6 = por %p98_p5, %p97_p4 }
   0xf   :  { %p100_p7 = pnand %p99_p6, %p93_p3 }
  0x11   :  { %103 = shalt.err (!%p100_p7)
}
  0x12   :  { %30 = dma.hbm_to_vmem [thread:$0]  %s249_s1, 256, %s28_s13, [#allocation6]  }
  0x13   :  { %s104_s28 = scalar_lea.hbm %s248_s0, 256 }
  0x14   :  { %p105_p8 = scmp.ne.s32.totalorder %s248_s0, %s104_s28  ;;  %p108_p9 = scmp.lt.u32.totalorder %s104_s28, %s248_s0 }
  0x16   :  { %p110_p10 = pnand %p108_p9, %p105_p8 }
  0x18   :  { %113 = shalt.err (!%p110_p10)
}
  0x19   :  { %s114_s6 = scalar_lea.vmem %s18_s15, 256  ;;  %p119_p12 = scmp.lt.s32.totalorder %s18_s15, %s18_s15 }
  0x1a   :  { %p115_p11 = scmp.ne.s32.totalorder %s18_s15, %s114_s6  ;;  %p120_p13 = scmp.lt.s32.totalorder %s114_s6, %s114_s6 }
  0x1c   :  { %p121_p0 = por %p120_p13, %p119_p12 }
  0x1e   :  { %p122_p1 = pnand %p121_p0, %p115_p11 }
  0x20   :  { %125 = shalt.err (!%p122_p1)
}
  0x21   :  { %20 = dma.hbm_to_vmem [thread:$0]  %s248_s0, 256, %s18_s15, [#allocation3]  }
  0x22   :  { %s178_s8 = smov [#allocation7]   ;;  %s126_s12 = scalar_lea.hbm %s250_s2, 256 }
  0x23   :  { %s37_s9 = sshll.u32 %s178_s8, 4  ;;  %p127_p2 = scmp.ne.s32.totalorder %s250_s2, %s126_s12  ;;  %s38_s9 = int_to_ptr.vmem [resolvable:$true] %s37_s9 }
  0x24   :  { %p130_p3 = scmp.lt.u32.totalorder %s126_s12, %s250_s2 }
  0x26   :  { %p132_p4 = pnand %p130_p3, %p127_p2 }
  0x28   :  { %135 = shalt.err (!%p132_p4)
}
  0x29   :  { %s136_s18 = scalar_lea.vmem %s38_s9, 256  ;;  %p141_p6 = scmp.lt.s32.totalorder %s38_s9, %s38_s9 }
  0x2a   :  { %p137_p5 = scmp.ne.s32.totalorder %s38_s9, %s136_s18  ;;  %p142_p7 = scmp.lt.s32.totalorder %s136_s18, %s136_s18 }
  0x2c   :  { %p143_p8 = por %p142_p7, %p141_p6 }
  0x2e   :  { %p144_p9 = pnand %p143_p8, %p137_p5 }
  0x30   :  { %147 = shalt.err (!%p144_p9)
}
  0x31   :  { %40 = dma.hbm_to_vmem [thread:$0]  %s250_s2, 256, %s38_s9, [#allocation6]  }
  0x32   :  { %170 = dma.done.wait [#allocation3], 256  }
  0x33   :  { %171 = vsyncadd [#allocation3], 4294967040 }
  0x34   :  { %172 = dma.done.wait [#allocation6], 512  }
  0x35   :  { %173 = vsyncadd [#allocation6], 4294966784  ;;  %v50_v0 = vld [vmem:[#allocation2] sm:$0xff]  ;;  %v52_v1 = vld [vmem:[#allocation5] sm:$0xff]  ;;  %s179_s19 = smov [#allocation8]  }
  0x36   :  { %v56_v2 = vld [vmem:[#allocation7] sm:$0xff]  ;;  %v54_v3 = vmul.f32 %v52_v1, %v50_v0  ;;  %v51_v4 = vld [vmem:[#allocation2 + $0x8] sm:$0xff]  ;;  %v53_v5 = vld [vmem:[#allocation5 + $0x8] sm:$0xff]  ;;  %s68_s20 = sshll.u32 %s179_s19, 4  ;;  %s69_s20 = int_to_ptr.vmem [resolvable:$true] %s68_s20 }
  0x37   :  { %v57_v6 = vld [vmem:[#allocation7 + $0x8] sm:$0xff]  ;;  %v55_v7 = vmul.f32 %v53_v5, %v51_v4  ;;  %s148_s2 = scalar_lea.vmem %s69_s20, 256  ;;  %p153_p11 = scmp.lt.s32.totalorder %s69_s20, %s69_s20 }
  0x38   :  { %v58_v8 = vadd.f32 %v56_v2, %v54_v3  ;;  %p149_p10 = scmp.ne.s32.totalorder %s69_s20, %s148_s2  ;;  %p154_p12 = scmp.lt.s32.totalorder %s148_s2, %s148_s2 }
  0x39   :  { %v59_v9 = vadd.f32 %v57_v6, %v55_v7 }
  0x3a   :  { %60 = vst [vmem:[#allocation8] sm:$0xff] %v58_v8  ;;  %p155_p13 = por %p154_p12, %p153_p11 }
  0x3b   :  { %61 = vst [vmem:[#allocation8 + $0x8] sm:$0xff] %v59_v9 }
  0x3c   :  { %p156_p0 = pnand %p155_p13, %p149_p10 }
  0x3e   :  { %159 = shalt.err (!%p156_p0)
}
  0x3f   :  { %s160_s23 = scalar_lea.hbm %s251_s3, 256 }
  0x40   :  { %p161_p1 = scmp.ne.s32.totalorder %s251_s3, %s160_s23  ;;  %p164_p2 = scmp.lt.u32.totalorder %s160_s23, %s251_s3 }
  0x42   :  { %p166_p3 = pnand %p164_p2, %p161_p1 }
  0x44   :  { %169 = shalt.err (!%p166_p3)
}
  0x45   :  { %71 = dma.vmem_to_hbm [thread:$0]  %s69_s20, 256, %s251_s3, [#allocation4]  }
  0x46   :  { %174 = dma.done.wait [#allocation4], 256  }
  0x47   :  { %175 = vsyncadd [#allocation4], 4294967040 }
  0x48   :  { %75 = vsyncpa [#allocation3], 1 }
  0x49   :  { %76 = vsyncpa [#allocation6], 1 }
  0x4a   :  { %77 = vsyncpa [#allocation4], 1 }

</bundles_post_ra>
